<compile_context>
chip_gen: v7x
topology: tpu7x:2x2x1
jax: 0.10.0
libtpu: 0.0.40
codegen_flags: <defaults>
</compile_context>

<pallas_src>
import functools

import jax
import jax.numpy as jnp
from jax.experimental import pallas as pl
from jax.experimental.pallas import tpu as pltpu


# ----------------------------- small helpers --------------------------------


def _round_up(x, m):
    return ((x + m - 1) // m) * m


def _pick_m_tile(m, target=512):
    """Largest multiple-of-8 divisor of m that is <= target (else full m)."""
    if m <= target:
        return m
    for t in range(target, 0, -8):
        if m % t == 0:
            return t
    return m


def _largest_divisor_leq(n, target):
    t = min(n, target)
    while n % t:
        t -= 1
    return t


@functools.lru_cache(maxsize=1)
def _vmem_limit_bytes():
    """Generation-dependent scoped-VMEM limit with headroom (None -> default)."""
    try:
        info = pltpu.get_tpu_info()
        cap = getattr(info, "vmem_capacity_bytes", None)
        if cap:
            return int(cap * 0.8)
    except Exception:
        pass
    return None


def _compiler_params(dimension_semantics):
    kw = dict(dimension_semantics=dimension_semantics)
    lim = _vmem_limit_bytes()
    if lim is not None:
        kw["vmem_limit_bytes"] = lim
    return pltpu.CompilerParams(**kw)


# --------------------------- Pallas kernels --------------------------------


def _gru_in_proj_kernel(x_ref, w_ref, b_ref, gi_ref, *, gates_per_dir):
    """Hoisted input projection, both directions fused along N.

    x_ref:  (TM, D_in) f32        w_ref: (D_in, direction*3Hp) bf16
    b_ref:  (1, direction*3Hp) f32
    gi_ref: (direction, TM, 3Hp) bf16
    """
    x = x_ref[...].astype(jnp.bfloat16)
    acc = jnp.dot(x, w_ref[...], preferred_element_type=jnp.float32)
    acc = acc + b_ref[...]
    for d in range(gi_ref.shape[0]):
        g0 = d * gates_per_dir
        gi_ref[d] = acc[:, g0:g0 + gates_per_dir].astype(gi_ref.dtype)


def _gru_rec_kernel(gi_ref, h0_ref, whh_ref, bhh_ref, out_ref, hT_ref,
                    *, chunk, hp, unroll):
    """Serial GRU recurrence; grid = (direction <parallel>, T-chunk <arbitrary>).

    gi_ref:  (Tc, B, 3Hp) bf16  (this direction, this time-chunk; forward order)
    h0_ref:  (B, Hp) f32        whh_ref: (Hp, 3Hp) bf16     bhh_ref: (1, 3Hp) f32
    out_ref: (Tc, B, Hp) f32    hT_ref:  (B, Hp) f32  (resident across chunks,
                                                        doubles as the h carry)
    """
    c = pl.program_id(1)
    rev = (pl.program_id(0) == 1).astype(jnp.int32)

    @pl.when(c == 0)
    def _():
        hT_ref[...] = h0_ref[...]

    whh = whh_ref[...]
    bhh = bhh_ref[...]

    def step(t, h_prev):
        # forward: idx = t ; reverse: idx = chunk-1-t  (scalar arithmetic only)
        idx = t + rev * (chunk - 1 - 2 * t)
        gi = gi_ref[idx].astype(jnp.float32)                         # (B, 3Hp)
        gh = jnp.dot(h_prev.astype(jnp.bfloat16), whh,
                     preferred_element_type=jnp.float32) + bhh       # (B, 3Hp)
        # Hp-aligned gate column blocks [r | z | n] (PyTorch order).
        r = jax.nn.sigmoid(gi[:, 0:hp] + gh[:, 0:hp])
        z = jax.nn.sigmoid(gi[:, hp:2 * hp] + gh[:, hp:2 * hp])
        n = jnp.tanh(gi[:, 2 * hp:3 * hp] + r * gh[:, 2 * hp:3 * hp])
        h_new = (1.0 - z) * n + z * h_prev
        out_ref[idx] = h_new.astype(out_ref.dtype)
        return h_new

    h_last = jax.lax.fori_loop(0, chunk, step, hT_ref[...], unroll=unroll)
    hT_ref[...] = h_last.astype(hT_ref.dtype)


# ----------------------------- layer wrapper --------------------------------


def gru_layer(x, h0_pad, w_s1, b_s1, whh_s, bhh_s, *, h_pad, direction):
    """One GRU layer (all directions) with two Pallas kernels.

    x:      (T, B, D_in) f32     h0_pad: (direction, B, Hp) f32
    w_s1:   (D_in, direction*3Hp) bf16   b_s1: (1, direction*3Hp) f32
    whh_s:  (direction, Hp, 3Hp) bf16    bhh_s: (direction, 1, 3Hp) f32
    returns out (T, B, direction*Hp) f32 (concatenated, padded layout),
            hT  (direction, B, Hp) f32
    """
    T, B, d_in = x.shape
    hp = h_pad
    g = 3 * hp
    m = T * B
    x2d = x.reshape(m, d_in)

    # ---- stage 1: hoisted input projection, M-tiled, directions fused in N --
    tm = _pick_m_tile(m)
    gi = pl.pallas_call(
        functools.partial(_gru_in_proj_kernel, gates_per_dir=g),
        out_shape=jax.ShapeDtypeStruct((direction, m, g), jnp.bfloat16),
        grid_spec=pltpu.PrefetchScalarGridSpec(
            num_scalar_prefetch=0,
            grid=(m // tm,),
            in_specs=[
                pl.BlockSpec((tm, d_in), lambda i: (i, 0)),
                pl.BlockSpec((d_in, direction * g), lambda i: (0, 0)),
                pl.BlockSpec((1, direction * g), lambda i: (0, 0)),
            ],
            out_specs=pl.BlockSpec((direction, tm, g), lambda i: (0, i, 0)),
        ),
        compiler_params=_compiler_params(("parallel",)),
    )(x2d, w_s1, b_s1)

    gi = gi.reshape(direction, T, B, g)   # contiguous split -> free

    # ---- stage 2: serial recurrence, time-chunked, h carried in hT block ---
    tc = _largest_divisor_leq(T, 256)
    n_chunks = T // tc

    def gi_map(d, c):
        rc = c + d * (n_chunks - 1 - 2 * c)      # reverse chunk walk for d==1
        return (d, rc, 0, 0)

    def out_map(d, c):
        rc = c + d * (n_chunks - 1 - 2 * c)
        return (rc, 0, d)                        # concatenated feature layout

    out, hT = pl.pallas_call(
        functools.partial(_gru_rec_kernel, chunk=tc, hp=hp,
                          unroll=min(8, tc)),
        out_shape=(
            jax.ShapeDtypeStruct((T, B, direction * hp), jnp.float32),
            jax.ShapeDtypeStruct((direction, B, hp), jnp.float32),
        ),
        grid_spec=pltpu.PrefetchScalarGridSpec(
            num_scalar_prefetch=0,
            grid=(direction, n_chunks),
            in_specs=[
                pl.BlockSpec((None, tc, B, g), gi_map),
                pl.BlockSpec((None, B, hp), lambda d, c: (d, 0, 0)),
                pl.BlockSpec((None, hp, g), lambda d, c: (d, 0, 0)),
                pl.BlockSpec((None, 1, g), lambda d, c: (d, 0, 0)),
            ],
            out_specs=[
                pl.BlockSpec((tc, B, hp), out_map),
                pl.BlockSpec((None, B, hp), lambda d, c: (d, 0, 0)),
            ],
        ),
        compiler_params=_compiler_params(("parallel", "arbitrary")),
    )(gi, h0_pad, whh_s, bhh_s)
    return out, hT


# ----------------------------- module port ----------------------------------


def _pad_gate_cols(mat_t, h, hp):
    """(rows, 3H) -> (rows, 3Hp), gate g placed at cols [g*Hp : g*Hp + H]."""
    rows = mat_t.shape[0]
    out = jnp.zeros((rows, 3 * hp), mat_t.dtype)
    for gate in range(3):
        out = out.at[:, gate * hp:gate * hp + h].set(
            mat_t[:, gate * h:(gate + 1) * h])
    return out


def _prep_wih(w_ih, in_blocks, h, hp):
    """PyTorch w_ih (3H, in_real) -> padded transposed (in_pad, 3Hp)."""
    w_cols = _pad_gate_cols(w_ih.T, h, hp)                  # (in_real, 3Hp)
    in_pad = sum(p for _, p in in_blocks)
    out = jnp.zeros((in_pad, 3 * hp), w_ih.dtype)
    ro, po = 0, 0
    for real, padded in in_blocks:
        out = out.at[po:po + real, :].set(w_cols[ro:ro + real, :])
        ro += real
        po += padded
    return out


def _prep_whh(w_hh, h, hp):
    """PyTorch w_hh (3H, H) -> padded transposed (Hp, 3Hp)."""
    w_cols = _pad_gate_cols(w_hh.T, h, hp)                  # (H, 3Hp)
    return jnp.zeros((hp, 3 * hp), w_hh.dtype).at[:h, :].set(w_cols)


class EncoderRNNPallas:
    """JAX/Pallas port of the PyTorch EncoderRNN module (eval-mode forward)."""

    def __init__(self, input_size, hidden_size, n_layers, direction, dropout,
                 key):
        assert direction in (1, 2)
        self.input_size = input_size
        self.hidden_size = hidden_size
        self.n_layers = n_layers
        self.direction = direction
        self.dropout = dropout          # eval-mode: unused
        h = hidden_size
        hp = _round_up(h, 128)          # lane-dense hidden width
        self.h_pad = hp

        bound = 1.0 / float(h) ** 0.5
        self.params = {}                # PyTorch-layout params (reference)
        self.stacked = []               # padded / transposed / stacked (kernels)
        for layer in range(n_layers):
            in_real = input_size if layer == 0 else h * direction
            in_blocks = ([(input_size, input_size)] if layer == 0
                         else [(h, hp)] * direction)
            wih_l, bih_l, whh_l, bhh_l = [], [], [], []
            for d in range(direction):
                key, k1, k2, k3, k4 = jax.random.split(key, 5)
                p = dict(
                    w_ih=jax.random.uniform(k1, (3 * h, in_real), jnp.float32,
                                            -bound, bound),
                    w_hh=jax.random.uniform(k2, (3 * h, h), jnp.float32,
                                            -bound, bound),
                    b_ih=jax.random.uniform(k3, (3 * h,), jnp.float32,
                                            -bound, bound),
                    b_hh=jax.random.uniform(k4, (3 * h,), jnp.float32,
                                            -bound, bound),
                )
                self.params[(layer, d)] = p
                wih_l.append(_prep_wih(p["w_ih"], in_blocks, h, hp))
                bih_l.append(_pad_gate_cols(p["b_ih"].reshape(1, 3 * h), h, hp))
                whh_l.append(_prep_whh(p["w_hh"], h, hp))
                bhh_l.append(_pad_gate_cols(p["b_hh"].reshape(1, 3 * h), h, hp))
            w_s1 = jnp.concatenate(wih_l, axis=1).astype(jnp.bfloat16)
            b_s1 = jnp.concatenate(bih_l, axis=1)
            whh_s = jnp.stack(whh_l, 0).astype(jnp.bfloat16)
            bhh_s = jnp.stack(bhh_l, 0)
            self.stacked.append((w_s1, b_s1, whh_s, bhh_s))

    def initHidden(self, batch_size):
        return jnp.zeros(
            (self.n_layers * self.direction, batch_size, self.hidden_size),
            jnp.float32)

    def forward(self, inp, hidden):
        """inp: (T, B, input_size); hidden: (n_layers*direction, B, H)."""
        T, B, _ = inp.shape
        h, hp, nd = self.hidden_size, self.h_pad, self.direction
        x = inp
        h_finals = []
        for layer in range(self.n_layers):
            w_s1, b_s1, whh_s, bhh_s = self.stacked[layer]
            h0 = hidden[layer * nd:(layer + 1) * nd]            # (nd, B, H)
            h0p = jnp.zeros((nd, B, hp), jnp.float32).at[:, :, :h].set(h0)
            out, hT = gru_layer(x, h0p, w_s1, b_s1, whh_s, bhh_s,
                                h_pad=hp, direction=nd)
            h_finals.append(hT[:, :, :h])
            x = out          # stays padded/concatenated between layers (no HBM concat)
        out_final = x.reshape(T, B, nd, hp)[..., :h].reshape(T, B, nd * h)
        return out_final, jnp.concatenate(h_finals, axis=0)


# ------------------------- pure-JAX reference -------------------------------


def _gru_cell_ref(x_t, h_prev, w_ih, w_hh, b_ih, b_hh):
    h = h_prev.shape[-1]
    gi = x_t @ w_ih.T + b_ih
    gh = h_prev @ w_hh.T + b_hh
    r = jax.nn.sigmoid(gi[:, :h] + gh[:, :h])
    z = jax.nn.sigmoid(gi[:, h:2 * h] + gh[:, h:2 * h])
    n = jnp.tanh(gi[:, 2 * h:] + r * gh[:, 2 * h:])
    return (1.0 - z) * n + z * h_prev


def _gru_dir_ref(x, h0, p, reverse):
    xs = x[::-1] if reverse else x

    def step(h, x_t):
        h_new = _gru_cell_ref(x_t, h, p["w_ih"], p["w_hh"], p["b_ih"],
                              p["b_hh"])
        return h_new, h_new

    hT, ys = jax.lax.scan(step, h0, xs)
    if reverse:
        ys = ys[::-1]
    return ys, hT


def forward_ref(model, inp, hidden):
    x = inp
    h_finals = []
    for layer in range(model.n_layers):
        outs = []
        for d in range(model.direction):
            p = model.params[(layer, d)]
            h0 = hidden[layer * model.direction + d]
            o, hT = _gru_dir_ref(x, h0, p, reverse=(d == 1))
            outs.append(o)
            h_finals.append(hT)
        x = jnp.concatenate(outs, axis=-1) if model.direction == 2 else outs[0]
    return x, jnp.stack(h_finals, axis=0)


# --------------------------------- main --------------------------------------


if __name__ == "__main__":
    T, B = 8, 2
    input_size, hidden_size = 16, 32
    n_layers, direction, dropout = 2, 2, 0.0

    key = jax.random.PRNGKey(0)
    key, kp, kx = jax.random.split(key, 3)

    model = EncoderRNNPallas(input_size, hidden_size, n_layers, direction,
                             dropout, kp)

    inp = jax.random.normal(kx, (T, B, input_size), jnp.float32)
    hidden = model.initHidden(B)

    output, hidden_out = model.forward(inp, hidden)
    output = jax.block_until_ready(output)
    hidden_out = jax.block_until_ready(hidden_out)

    assert output.shape == (T, B, direction * hidden_size)
    assert hidden_out.shape == (n_layers * direction, B, hidden_size)

    out_ref, hid_ref = forward_ref(model, inp, hidden)
    # bf16 gi / bf16 matmul operands -> slightly looser tolerance than pure f32.
    assert jnp.allclose(output, out_ref, rtol=2e-2, atol=2e-2)
    assert jnp.allclose(hidden_out, hid_ref, rtol=2e-2, atol=2e-2)

    print("KERNEL_OK")
</pallas_src>

<mosaic_0001>
module attributes {stable_mosaic.version = 11 : i64} {
  func.func @_gru_in_proj_kernel(%arg0: i32, %arg1: memref<16x16xf32, #tpu.memory_space<vmem>>, %arg2: memref<16x768xbf16, #tpu.memory_space<vmem>>, %arg3: memref<1x768xf32, #tpu.memory_space<vmem>>, %arg4: memref<2x16x384xbf16, #tpu.memory_space<vmem>>) attributes {dimension_semantics = [#tpu.dimension_semantics<parallel>], iteration_bounds = array<i64: 1>, scalar_prefetch = 0 : i64, scratch_operands = 0 : i64, tpu.core_type = #tpu.core_type<tc>, window_params = [{transform_indices = @transform_0, window_bounds = array<i64: 16, 16>}, {pipeline_mode = #tpu.pipeline_mode<synchronous>, transform_indices = @transform_1, window_bounds = array<i64: 16, 768>}, {pipeline_mode = #tpu.pipeline_mode<synchronous>, transform_indices = @transform_2, window_bounds = array<i64: 1, 768>}, {transform_indices = @transform_3, window_bounds = array<i64: 2, 16, 384>}]} {
    %c0 = arith.constant 0 : index
    %c0_0 = arith.constant 0 : index
    %0 = vector.load %arg1[%c0, %c0_0] : memref<16x16xf32, #tpu.memory_space<vmem>>, vector<16x16xf32>
    %1 = arith.truncf %0 : vector<16x16xf32> to vector<16x16xbf16>
    %c0_1 = arith.constant 0 : index
    %c0_2 = arith.constant 0 : index
    %2 = vector.load %arg2[%c0_1, %c0_2] : memref<16x768xbf16, #tpu.memory_space<vmem>>, vector<16x768xbf16>
    %cst = arith.constant dense<0.000000e+00> : vector<16x768xf32>
    %3 = tpu.matmul %1, %2, %cst {dimension_numbers = #tpu.dot_dimension_numbers<[1], [0], [0], [1], [0, 0, 1, 1], [], []>} : vector<16x16xbf16>, vector<16x768xbf16>, vector<16x768xf32> -> vector<16x768xf32>
    %c0_3 = arith.constant 0 : index
    %c0_4 = arith.constant 0 : index
    %4 = vector.load %arg3[%c0_3, %c0_4] : memref<1x768xf32, #tpu.memory_space<vmem>>, vector<1x768xf32>
    %5 = vector.broadcast %4 : vector<1x768xf32> to vector<16x768xf32>
    %6 = arith.addf %3, %5 : vector<16x768xf32>
    %7 = vector.extract_strided_slice %6 {offsets = [0, 0], sizes = [16, 384], strides = [1, 1]} : vector<16x768xf32> to vector<16x384xf32>
    %8 = arith.truncf %7 : vector<16x384xf32> to vector<16x384xbf16>
    %c0_5 = arith.constant 0 : index
    %c0_6 = arith.constant 0 : index
    %c0_7 = arith.constant 0 : index
    %9 = vector.load %arg4[%c0_5, %c0_6, %c0_7] : memref<2x16x384xbf16, #tpu.memory_space<vmem>>, vector<1x16x384xbf16>
    %10 = vector.shape_cast %9 : vector<1x16x384xbf16> to vector<16x384xbf16>
    %11 = vector.shape_cast %8 : vector<16x384xbf16> to vector<1x16x384xbf16>
    tpu.vector_store %arg4[%c0_5, %c0_6, %c0_7], %11 {strides = array<i32>} : memref<2x16x384xbf16, #tpu.memory_space<vmem>>, vector<1x16x384xbf16>,
    %12 = vector.extract_strided_slice %6 {offsets = [0, 384], sizes = [16, 384], strides = [1, 1]} : vector<16x768xf32> to vector<16x384xf32>
    %13 = arith.truncf %12 : vector<16x384xf32> to vector<16x384xbf16>
    %c1 = arith.constant 1 : index
    %c0_8 = arith.constant 0 : index
    %c0_9 = arith.constant 0 : index
    %14 = vector.load %arg4[%c1, %c0_8, %c0_9] : memref<2x16x384xbf16, #tpu.memory_space<vmem>>, vector<1x16x384xbf16>
    %15 = vector.shape_cast %14 : vector<1x16x384xbf16> to vector<16x384xbf16>
    %16 = vector.shape_cast %13 : vector<16x384xbf16> to vector<1x16x384xbf16>
    tpu.vector_store %arg4[%c1, %c0_8, %c0_9], %16 {strides = array<i32>} : memref<2x16x384xbf16, #tpu.memory_space<vmem>>, vector<1x16x384xbf16>,
    return
  }
  func.func @transform_0(%arg0: i32) -> (i32, i32) {
    %c0_i32 = arith.constant 0 : i32
    %c0_i32_0 = arith.constant 0 : i32
    return %arg0, %c0_i32 : i32, i32
  }
  func.func @transform_1(%arg0: i32) -> (i32, i32) {
    %c0_i32 = arith.constant 0 : i32
    %c0_i32_0 = arith.constant 0 : i32
    %c0_i32_1 = arith.constant 0 : i32
    return %c0_i32, %c0_i32_0 : i32, i32
  }
  func.func @transform_2(%arg0: i32) -> (i32, i32) {
    %c0_i32 = arith.constant 0 : i32
    %c0_i32_0 = arith.constant 0 : i32
    %c0_i32_1 = arith.constant 0 : i32
    return %c0_i32, %c0_i32_0 : i32, i32
  }
  func.func @transform_3(%arg0: i32) -> (i32, i32, i32) {
    %c0_i32 = arith.constant 0 : i32
    %c0_i32_0 = arith.constant 0 : i32
    %c0_i32_1 = arith.constant 0 : i32
    return %c0_i32, %arg0, %c0_i32_0 : i32, i32, i32
  }
}

</mosaic_0001>

<bundles_post_ra>
// kernel: tpu_custom_call.1
= control target key start
LH: loop header
LB: loop body
LE: loop exit
PB: predicated region body
PF: predicated region fallthrough
CT: control target
= control target key end

     0   :  { %8 = vsyncpa [#allocation3], 0  ;;  %s500_s0 = inlined_call_operand.hbm [shape: f32[16,16], index: 0, kind: input, shape index: {}]   ;;  %s501_s1 = inlined_call_operand.hbm [shape: bf16[16,768], index: 1, kind: input, shape index: {}]   ;;  %s502_s2 = inlined_call_operand.vmem [shape: f32[1,768], index: 2, kind: input, shape index: {}]   ;;  %s503_s3 = inlined_call_operand.hbm [shape: bf16[2,16,384], index: 3, kind: output, shape index: {}]  }
   0x1   :  { %9 = vsyncpa [#allocation6], 0 }
   0x2   :  { %10 = vsyncpa [#allocation4], 0  ;;  %s431_s12 = smov [#allocation2]   ;;  %s359_s16 = scalar_lea.hbm %s500_s0, 256 }
   0x3   :  { %s16_s13 = sshll.u32 %s431_s12, 4  ;;  %p360_p0 = scmp.ne.s32.totalorder %s500_s0, %s359_s16  ;;  %s17_s13 = int_to_ptr.vmem [resolvable:$true] %s16_s13 }
   0x4   :  { %p363_p1 = scmp.lt.u32.totalorder %s359_s16, %s500_s0 }
   0x6   :  { %p365_p2 = pnand %p363_p1, %p360_p0 }
   0x8   :  { %368 = shalt.err (!%p365_p2)
}
   0x9   :  { %s369_s21 = scalar_lea.vmem %s17_s13, 256  ;;  %p374_p4 = scmp.lt.s32.totalorder %s17_s13, %s17_s13 }
   0xa   :  { %p370_p3 = scmp.ne.s32.totalorder %s17_s13, %s369_s21  ;;  %p375_p5 = scmp.lt.s32.totalorder %s369_s21, %s369_s21 }
   0xc   :  { %p376_p6 = por %p375_p5, %p374_p4 }
   0xe   :  { %p377_p7 = pnand %p376_p6, %p370_p3 }
  0x10   :  { %380 = shalt.err (!%p377_p7)
}
  0x11   :  { %s432_s22 = smov 128   ;;  %s433_s23 = smov 8  }
  0x12   :  { %22 = dma.hbm_to_vmem [thread:$0]  %s500_s0, 256, %s17_s13, [#allocation3], %s432_s22, %s432_s22, %s433_s23  }
  0x13   :  { %s434_s26 = smov [#allocation5]   ;;  %s381_s30 = scalar_lea.hbm %s501_s1, 768 }
  0x14   :  { %s28_s27 = sshll.u32 %s434_s26, 4  ;;  %p382_p8 = scmp.ne.s32.totalorder %s501_s1, %s381_s30  ;;  %s29_s27 = int_to_ptr.vmem [resolvable:$true] %s28_s27 }
  0x15   :  { %p385_p9 = scmp.lt.u32.totalorder %s381_s30, %s501_s1 }
  0x17   :  { %p387_p10 = pnand %p385_p9, %p382_p8 }
  0x19   :  { %390 = shalt.err (!%p387_p10)
}
  0x1a   :  { %s391_s8 = scalar_lea.vmem %s29_s27, 768  ;;  %p396_p12 = scmp.lt.s32.totalorder %s29_s27, %s29_s27 }
  0x1b   :  { %p392_p11 = scmp.ne.s32.totalorder %s29_s27, %s391_s8  ;;  %p397_p13 = scmp.lt.s32.totalorder %s391_s8, %s391_s8 }
  0x1d   :  { %p398_p0 = por %p397_p13, %p396_p12 }
  0x1f   :  { %p399_p1 = pnand %p398_p0, %p392_p11 }
  0x21   :  { %402 = shalt.err (!%p399_p1)
}
  0x22   :  { %s435_s0 = smov 384   ;;  %s436_s9 = smov 24  }
  0x23   :  { %34 = dma.hbm_to_vmem [thread:$0]  %s501_s1, 768, %s29_s27, [#allocation6], %s435_s0, %s435_s0, %s436_s9  }
  0x24   :  { %425 = dma.done.wait [#allocation3], 256  }
  0x25   :  { %426 = vsyncadd [#allocation3], 4294967040 }
  0x26   :  { %427 = dma.done.wait [#allocation6], 768  }
  0x27   :  { %428 = vsyncadd [#allocation6], 4294966528  ;;  %v437_v0 = vmov 0   ;;  %v350_v1 = vld [vmem:[#allocation5 + $0x4] ss:$24 sps:$4 sm:$0xff]   ;;  %v44_v3 = vld [vmem:[#allocation2] sm:$0xff]  ;;  %v55_v10 = vlaneseq }
  0x28   :  { %151 = vmatprep.mubr.bf16.mxu0 %v437_v0  ;;  %194 = vmatprep.mubr.bf16.mxu1 %v437_v0  ;;  %v352_v2 = vld [vmem:[#allocation5] ss:$24 sps:$4 sm:$0xff]   ;;  %v353_v6 = vld [vmem:[#allocation5 + $0x10] ss:$24 sps:$4 sm:$0xff]   ;;  %vm115_vm0 = vcmask 130048  }
  0x29   :  { %v45_v4 = vld [vmem:[#allocation2 + $0x8] sm:$0xff]  ;;  %119 = vmatprep.subr.bf16.mxu0 %v350_v1  ;;  %v355_v7 = vld [vmem:[#allocation5 + $0x14] ss:$24 sps:$4 sm:$0xff]   ;;  %v358_v9 = vld [vmem:[#allocation5 + $0x8] ss:$24 sps:$4 sm:$0xff]   ;;  %v56_v11 = vshrl.u32 %v55_v10, 7 }
  0x2a   :  { %v46_v5 = vpack.c.bf16 %v45_v4, %v44_v3  ;;  %120 = vmatpush1.bf16.msra.mxu0 %v352_v2  ;;  %v356_v8 = vld [vmem:[#allocation5 + $0xc] ss:$24 sps:$4 sm:$0xff]   ;;  %v53_v13 = vld [vmem:[%s502_s2] sm:$0x3f]  ;;  %s438_s2 = smov [#allocation7]  }
  0x2b   :  { %205 = vmatprep.subr.bf16.mxu0 %v355_v7  ;;  %162 = vmatprep.subr.bf16.mxu1 %v356_v8  ;;  %v57_v12 = vsub.s32 0, %v56_v11  ;;  %v61_v14 = vsub.s32 1, %v56_v11  ;;  %v65_v16 = vsub.s32 2, %v56_v11  ;;  %v69_v18 = vsub.s32 3, %v56_v11  ;;  %s302_s13 = sshll.u32 %s438_s2, 4  ;;  %s303_s13 = int_to_ptr.vmem [resolvable:$true] %s302_s13 }
  0x2c   :  { %163 = vmatpush1.bf16.msra.mxu1 %v358_v9  ;;  %v73_v23 = vsub.s32 4, %v56_v11  ;;  %v77_v26 = vsub.s32 5, %v56_v11  ;;  %s403_s14 = scalar_lea.vmem %s303_s13, 768  ;;  %p408_p3 = scmp.lt.s32.totalorder %s303_s13, %s303_s13 }
  0x2d   :  { %321 = vmatmul.mubr.msk.bf16.vlgmr.msra.gmra.mrb[0].mxu0 %vm115_vm0, %v46_v5  ;;  %v58_v15 = vrot.slane %v53_v13, %v57_v12  ;;  %v62_v17 = vrot.slane %v53_v13, %v61_v14  ;;  %v66_v22 = vrot.slane %v53_v13, %v65_v16  ;;  %v70_v29 = vrot.slane %v53_v13, %v69_v18  ;;  %p404_p2 = scmp.ne.s32.totalorder %s303_s13, %s403_s14  ;;  %p409_p4 = scmp.lt.s32.totalorder %s403_s14, %s403_s14 }
  0x2e   :  { %206 = vmatpush1.bf16.msra.mxu0 %v353_v6  ;;  %237 = vmatprep.mubr.bf16.mxu0 %v437_v0  ;;  %v74_v35 = vrot.slane %v53_v13, %v73_v23  ;;  %v78_v38 = vrot.slane %v53_v13, %v77_v26 }
  0x2f   :  { %322 = vmatmul.mubr.msk.bf16.vlgmr.msra.gmra.mrb[0].mxu1 %vm115_vm0, %v46_v5  ;;  %p410_p5 = por %p409_p4, %p408_p3 }
  0x31   :  { %p411_p6 = pnand %p410_p5, %p404_p2 }
  0x35   :  { %323 = vmatmul.mubr.msk.bf16.vlgmr.msra.gmra.mrb[4].mxu0 %vm115_vm0, %v46_v5 }
 0x100   :  { %v153_v19 = vpop.f32.mrb[0].mxu0 }
 0x101   :  { %v154_v20 = vadd.f32 %v153_v19, %v58_v15  ;;  %v155_v21 = vpop.f32.mrb[1].mxu0 }
 0x102   :  { %v156_v24 = vadd.f32 %v155_v21, %v62_v17  ;;  %v157_v25 = vpop.f32.mrb[2].mxu0  ;;  %v196_v32 = vpop.f32.mrb[0].mxu1 }
 0x103   :  { %v158_v27 = vadd.f32 %v157_v25, %v58_v15  ;;  %v159_v28 = vpop.f32.mrb[3].mxu0  ;;  %v197_v33 = vadd.f32 %v196_v32, %v66_v22  ;;  %v198_v34 = vpop.f32.mrb[1].mxu1 }
 0x104   :  { %v332_v30 = vpack.c.bf16 %v156_v24, %v154_v20  ;;  %v160_v31 = vadd.f32 %v159_v28, %v62_v17  ;;  %v200_v37 = vpop.f32.mrb[2].mxu1  ;;  %v199_v40 = vadd.f32 %v198_v34, %v70_v29 }
 0x105   :  { %v333_v39 = vpack.c.bf16 %v197_v33, %v197_v33  ;;  %v201_v41 = vadd.f32 %v200_v37, %v66_v22  ;;  %v202_v42 = vpop.f32.mrb[3].mxu1 }
 0x106   :  { %268 = vst [vmem:[#allocation7] sm:$0xff] %v332_v30  ;;  %v334_v36 = vpack.c.bf16 %v160_v31, %v158_v27  ;;  %v203_v50 = vadd.f32 %v202_v42, %v70_v29 }
 0x107   :  { %269 = vst [vmem:[#allocation7 + $0x8] sm:$0xf] %v333_v39  ;;  %v335_v44 = vpack.c.bf16 %v201_v41, %v201_v41 }
 0x108   :  { %270 = vst [vmem:[#allocation7 + $0xc] sm:$0xff] %v334_v36  ;;  %v239_v43 = vpop.f32.mrb[4].mxu0 }
 0x109   :  { %v240_v45 = vadd.f32 %v239_v43, %v74_v35  ;;  %v241_v46 = vpop.f32.mrb[5].mxu0  ;;  %271 = vst [vmem:[#allocation7 + $0x14] sm:$0xf] %v335_v44 }
 0x10a   :  { %v242_v47 = vadd.f32 %v241_v46, %v78_v38  ;;  %v243_v48 = vpop.f32.mrb[6].mxu0 }
 0x10b   :  { %v336_v49 = vpack.c.bf16 %v240_v45, %v199_v40  ;;  %v244_v51 = vadd.f32 %v243_v48, %v74_v35  ;;  %v245_v52 = vpop.f32.mrb[7].mxu0 }
 0x10c   :  { %v337_v53 = vpack.c.bf16 %v242_v47, %v242_v47  ;;  %v246_v54 = vadd.f32 %v245_v52, %v78_v38 }
 0x10d   :  { %293 = vst [vmem:[#allocation7 + $0x18] sm:$0xff] %v336_v49  ;;  %v338_v55 = vpack.c.bf16 %v244_v51, %v203_v50 }
 0x10e   :  { %294 = vst [vmem:[#allocation7 + $0x20] sm:$0xf] %v337_v53  ;;  %v339_v56 = vpack.c.bf16 %v246_v54, %v246_v54 }
 0x10f   :  { %295 = vst [vmem:[#allocation7 + $0x24] sm:$0xff] %v338_v55 }
 0x110   :  { %296 = vst [vmem:[#allocation7 + $0x2c] sm:$0xf] %v339_v56 }
 0x111   :  { %414 = shalt.err (!%p411_p6)
}
 0x112   :  { %s415_s17 = scalar_lea.hbm %s503_s3, 768 }
 0x113   :  { %p416_p7 = scmp.ne.s32.totalorder %s503_s3, %s415_s17  ;;  %p419_p8 = scmp.lt.u32.totalorder %s415_s17, %s503_s3 }
 0x115   :  { %p421_p9 = pnand %p419_p8, %p416_p7 }
 0x117   :  { %424 = shalt.err (!%p421_p9)
}
 0x118   :  { %s439_s22 = smov 192   ;;  %s440_s23 = smov 12  }
 0x119   :  { %308 = dma.vmem_to_hbm [thread:$0]  %s303_s13, 768, %s503_s3, [#allocation4], %s439_s22, %s439_s22, %s440_s23  }
 0x11a   :  { %429 = dma.done.wait [#allocation4], 768  }
 0x11b   :  { %430 = vsyncadd [#allocation4], 4294966528 }
 0x11c   :  { %312 = vsyncpa [#allocation3], 1 }
 0x11d   :  { %313 = vsyncpa [#allocation6], 1 }
 0x11e   :  { %314 = vsyncpa [#allocation4], 1 }

</bundles_post_ra>
